<compile_context>
chip_gen: v6e
topology: v6e:2x2x1
jax: 0.10.0
libtpu: 0.0.40
codegen_flags: <defaults>
</compile_context>

<pallas_src>
import functools

import jax
import jax.numpy as jnp
import numpy as np
from jax.experimental import pallas as pl
from jax.experimental.pallas import tpu as pltpu


def _round_up(x: int, m: int) -> int:
    return (x + m - 1) // m * m


def joint_kernel(enc_ref, dec_ref, wo_ref, bo_ref, out_ref):
    # enc_ref: (1, tT, Jp)  f32   pre-projected encoder (+ encoder bias)
    # dec_ref: (1, tU, Jp)  f32   pre-projected decoder
    # wo_ref : (Jp, tV)     bf16  output weight tile
    # bo_ref : (1, tV)      f32   output bias tile
    # out_ref: (1, tT, tU, tV)
    enc = enc_ref[0]                                     # (tT, Jp)
    dec = dec_ref[0]                                     # (tU, Jp)

    # Broadcast add + tanh in f32 (VPU/EUP).
    h = jnp.tanh(enc[:, None, :] + dec[None, :, :])      # (tT, tU, Jp) f32
    tT, tU, Jp = h.shape

    # bf16 MXU path for the dominant matmul, f32 accumulation.
    h2 = h.astype(jnp.bfloat16).reshape(tT * tU, Jp)     # free merge (tU % 16 == 0)
    z = jnp.dot(h2, wo_ref[...], preferred_element_type=jnp.float32) + bo_ref[...]
    out_ref[0] = z.reshape(tT, tU, -1).astype(out_ref.dtype)


@functools.partial(jax.jit, static_argnames=("project_input", "tile_t", "tile_u", "tile_v"))
def joint_network_pallas(encoder_out, decoder_out, params, project_input=True,
                         tile_t=128, tile_u=64, tile_v=256):
    """encoder_out: (B, T, 1, D_enc), decoder_out: (B, 1, U, D_dec) -> (B, T, U, V).

    With project_input=False the inputs are assumed to already live in joint
    space: encoder_out (B, T, 1, J), decoder_out (B, 1, U, J).
    """
    we, be, wd, wo, bo = (params["we"], params["be"], params["wd"],
                          params["wo"], params["bo"])
    out_dtype = encoder_out.dtype

    B, T = encoder_out.shape[0], encoder_out.shape[1]
    U = decoder_out.shape[2]
    J, V = wo.shape

    # --- Hoisted projections (negligible FLOPs vs. the T*U*J*V output matmul) ---
    if project_input:
        enc = encoder_out.reshape(B, T, encoder_out.shape[-1])
        dec = decoder_out.reshape(B, U, decoder_out.shape[-1])
        enc_p = jnp.einsum("btd,dj->btj", enc, we) + be          # (B, T, J)
        dec_p = jnp.einsum("bud,dj->buj", dec, wd)               # (B, U, J)
    else:
        enc_p = encoder_out.reshape(B, T, encoder_out.shape[-1])  # already (B, T, J)
        dec_p = decoder_out.reshape(B, U, decoder_out.shape[-1])  # already (B, U, J)
    enc_p = enc_p.astype(jnp.float32)
    dec_p = dec_p.astype(jnp.float32)
    assert enc_p.shape[-1] == J and dec_p.shape[-1] == J

    # --- Tile sizes and padding (lane = 128, sublane = 8 / 16 for bf16) ---
    J_pad = _round_up(J, 128)

    if T <= tile_t:
        tT = _round_up(T, 8)
        T_pad = tT
    else:
        tT = tile_t
        T_pad = _round_up(T, tT)

    if U <= tile_u:
        tU = _round_up(U, 16)
        U_pad = tU
    else:
        tU = tile_u
        U_pad = _round_up(U, tU)

    if _round_up(V, 128) <= tile_v:
        tV = _round_up(V, 128)
        V_pad = tV
    else:
        tV = tile_v
        V_pad = _round_up(V, tV)

    enc_p = jnp.pad(enc_p, ((0, 0), (0, T_pad - T), (0, J_pad - J)))
    dec_p = jnp.pad(dec_p, ((0, 0), (0, U_pad - U), (0, J_pad - J)))
    wo_p = jnp.pad(wo, ((0, J_pad - J), (0, V_pad - V))).astype(jnp.bfloat16)
    bo_p = jnp.pad(bo, (0, V_pad - V)).reshape(1, V_pad).astype(jnp.float32)

    grid = (B, V_pad // tV, T_pad // tT, U_pad // tU)   # T/U innermost: wo/bo stay resident

    out = pl.pallas_call(
        joint_kernel,
        out_shape=jax.ShapeDtypeStruct((B, T_pad, U_pad, V_pad), out_dtype),
        grid_spec=pltpu.PrefetchScalarGridSpec(
            num_scalar_prefetch=0,
            grid=grid,
            in_specs=[
                pl.BlockSpec((1, tT, J_pad), lambda b, v, t, u: (b, t, 0)),
                pl.BlockSpec((1, tU, J_pad), lambda b, v, t, u: (b, u, 0)),
                pl.BlockSpec((J_pad, tV), lambda b, v, t, u: (0, v)),
                pl.BlockSpec((1, tV), lambda b, v, t, u: (0, v)),
            ],
            out_specs=pl.BlockSpec((1, tT, tU, tV), lambda b, v, t, u: (b, t, u, v)),
        ),
        compiler_params=pltpu.CompilerParams(
            dimension_semantics=("parallel", "parallel", "parallel", "parallel"),
            vmem_limit_bytes=64 * 1024 * 1024,   # v7x: shrink tile_u/tile_v if J is very large
        ),
    )(enc_p, dec_p, wo_p, bo_p)

    return out[:, :T, :U, :V]


def joint_network_ref(encoder_out, decoder_out, params, project_input=True):
    """Pure-JAX f32 reference mirroring the PyTorch forward."""
    we, be, wd, wo, bo = (params["we"], params["be"], params["wd"],
                          params["wo"], params["bo"])
    if project_input:
        enc_p = jnp.einsum("btod,dj->btoj", encoder_out, we) + be   # (B,T,1,J)
        dec_p = jnp.einsum("boud,dj->bouj", decoder_out, wd)        # (B,1,U,J)
    else:
        enc_p, dec_p = encoder_out, decoder_out
    logit = jnp.tanh(enc_p + dec_p)                                 # (B,T,U,J)
    return jnp.einsum("btuj,jv->btuv", logit, wo) + bo              # (B,T,U,V)


def make_params(key, encoder_output_size, decoder_output_size, joint_space_size, vocab_size):
    """Deterministic synthetic Linear params (stored as (in, out), biases 1D)."""
    k1, k2, k3, k4, k5 = jax.random.split(key, 5)

    def uinit(k, shape, fan_in):
        bound = 1.0 / np.sqrt(fan_in)
        return jax.random.uniform(k, shape, jnp.float32, -bound, bound)

    return {
        "we": uinit(k1, (encoder_output_size, joint_space_size), encoder_output_size),
        "be": uinit(k2, (joint_space_size,), encoder_output_size),
        "wd": uinit(k3, (decoder_output_size, joint_space_size), decoder_output_size),
        "wo": uinit(k4, (joint_space_size, vocab_size), joint_space_size),
        "bo": uinit(k5, (vocab_size,), joint_space_size),
    }


if __name__ == "__main__":
    B, T, U = 2, 8, 8
    D_enc, D_dec, J, V = 32, 16, 32, 128

    key = jax.random.PRNGKey(0)
    k_enc, k_dec, k_par, k_e2, k_d2 = jax.random.split(key, 5)

    encoder_out = jax.random.normal(k_enc, (B, T, 1, D_enc), jnp.float32)
    decoder_out = jax.random.normal(k_dec, (B, 1, U, D_dec), jnp.float32)
    params = make_params(k_par, D_enc, D_dec, J, V)

    # project_input=True (default hot path)
    z = jax.block_until_ready(joint_network_pallas(encoder_out, decoder_out, params))
    z_ref = jax.block_until_ready(joint_network_ref(encoder_out, decoder_out, params))
    assert z.shape == (B, T, U, V)
    # Tolerance accounts for the bf16 MXU path on the output projection.
    np.testing.assert_allclose(np.asarray(z), np.asarray(z_ref), rtol=2e-2, atol=2e-2)

    # project_input=False (inputs already in joint space)
    enc_j = jax.random.normal(k_e2, (B, T, 1, J), jnp.float32)
    dec_j = jax.random.normal(k_d2, (B, 1, U, J), jnp.float32)
    z2 = jax.block_until_ready(
        joint_network_pallas(enc_j, dec_j, params, project_input=False))
    z2_ref = jax.block_until_ready(
        joint_network_ref(enc_j, dec_j, params, project_input=False))
    assert z2.shape == (B, T, U, V)
    np.testing.assert_allclose(np.asarray(z2), np.asarray(z2_ref), rtol=2e-2, atol=2e-2)

    print("KERNEL_OK")
</pallas_src>

<mosaic_0001>
module attributes {stable_mosaic.version = 11 : i64} {
  func.func @joint_kernel(%arg0: i32, %arg1: i32, %arg2: i32, %arg3: i32, %arg4: memref<1x8x128xf32, #tpu.memory_space<vmem>>, %arg5: memref<1x16x128xf32, #tpu.memory_space<vmem>>, %arg6: memref<128x128xbf16, #tpu.memory_space<vmem>>, %arg7: memref<1x128xf32, #tpu.memory_space<vmem>>, %arg8: memref<1x8x16x128xf32, #tpu.memory_space<vmem>>) attributes {dimension_semantics = [#tpu.dimension_semantics<parallel>, #tpu.dimension_semantics<parallel>, #tpu.dimension_semantics<parallel>, #tpu.dimension_semantics<parallel>], iteration_bounds = array<i64: 2, 1, 1, 1>, scalar_prefetch = 0 : i64, scratch_operands = 0 : i64, tpu.core_type = #tpu.core_type<tc>, window_params = [{transform_indices = @transform_0, window_bounds = array<i64: 1, 8, 128>}, {transform_indices = @transform_1, window_bounds = array<i64: 1, 16, 128>}, {transform_indices = @transform_2, window_bounds = array<i64: 128, 128>}, {transform_indices = @transform_3, window_bounds = array<i64: 1, 128>}, {transform_indices = @transform_4, window_bounds = array<i64: 1, 8, 16, 128>}]} {
    %c0 = arith.constant 0 : index
    %c0_0 = arith.constant 0 : index
    %c0_1 = arith.constant 0 : index
    %0 = vector.load %arg4[%c0, %c0_0, %c0_1] : memref<1x8x128xf32, #tpu.memory_space<vmem>>, vector<1x8x128xf32>
    %1 = vector.shape_cast %0 : vector<1x8x128xf32> to vector<8x128xf32>
    %c0_2 = arith.constant 0 : index
    %c0_3 = arith.constant 0 : index
    %c0_4 = arith.constant 0 : index
    %2 = vector.load %arg5[%c0_2, %c0_3, %c0_4] : memref<1x16x128xf32, #tpu.memory_space<vmem>>, vector<1x16x128xf32>
    %3 = vector.shape_cast %2 : vector<1x16x128xf32> to vector<16x128xf32>
    %4 = vector.shape_cast %1 : vector<8x128xf32> to vector<8x1x128xf32>
    %5 = vector.shape_cast %3 : vector<16x128xf32> to vector<1x16x128xf32>
    %6 = vector.broadcast %4 : vector<8x1x128xf32> to vector<8x16x128xf32>
    %7 = vector.broadcast %5 : vector<1x16x128xf32> to vector<8x16x128xf32>
    %8 = arith.addf %6, %7 : vector<8x16x128xf32>
    %9 = math.tanh %8 : vector<8x16x128xf32>
    %10 = arith.truncf %9 : vector<8x16x128xf32> to vector<8x16x128xbf16>
    %11 = vector.shape_cast %10 : vector<8x16x128xbf16> to vector<128x128xbf16>
    %c0_5 = arith.constant 0 : index
    %c0_6 = arith.constant 0 : index
    %12 = vector.load %arg6[%c0_5, %c0_6] : memref<128x128xbf16, #tpu.memory_space<vmem>>, vector<128x128xbf16>
    %cst = arith.constant dense<0.000000e+00> : vector<128x128xf32>
    %13 = tpu.matmul %11, %12, %cst {dimension_numbers = #tpu.dot_dimension_numbers<[1], [0], [0], [1], [0, 0, 1, 1], [], []>} : vector<128x128xbf16>, vector<128x128xbf16>, vector<128x128xf32> -> vector<128x128xf32>
    %c0_7 = arith.constant 0 : index
    %c0_8 = arith.constant 0 : index
    %14 = vector.load %arg7[%c0_7, %c0_8] : memref<1x128xf32, #tpu.memory_space<vmem>>, vector<1x128xf32>
    %15 = vector.broadcast %14 : vector<1x128xf32> to vector<128x128xf32>
    %16 = arith.addf %13, %15 : vector<128x128xf32>
    %17 = vector.shape_cast %16 : vector<128x128xf32> to vector<8x16x128xf32>
    %c0_9 = arith.constant 0 : index
    %c0_10 = arith.constant 0 : index
    %c0_11 = arith.constant 0 : index
    %c0_12 = arith.constant 0 : index
    %18 = vector.load %arg8[%c0_9, %c0_10, %c0_11, %c0_12] : memref<1x8x16x128xf32, #tpu.memory_space<vmem>>, vector<1x8x16x128xf32>
    %19 = vector.shape_cast %18 : vector<1x8x16x128xf32> to vector<8x16x128xf32>
    %20 = vector.shape_cast %17 : vector<8x16x128xf32> to vector<1x8x16x128xf32>
    tpu.vector_store %arg8[%c0_9, %c0_10, %c0_11, %c0_12], %20 {strides = array<i32>} : memref<1x8x16x128xf32, #tpu.memory_space<vmem>>, vector<1x8x16x128xf32>,
    return
  }
  func.func @transform_0(%arg0: i32, %arg1: i32, %arg2: i32, %arg3: i32) -> (i32, i32, i32) {
    %c0_i32 = arith.constant 0 : i32
    %c0_i32_0 = arith.constant 0 : i32
    return %arg0, %arg2, %c0_i32 : i32, i32, i32
  }
  func.func @transform_1(%arg0: i32, %arg1: i32, %arg2: i32, %arg3: i32) -> (i32, i32, i32) {
    %c0_i32 = arith.constant 0 : i32
    %c0_i32_0 = arith.constant 0 : i32
    return %arg0, %arg3, %c0_i32 : i32, i32, i32
  }
  func.func @transform_2(%arg0: i32, %arg1: i32, %arg2: i32, %arg3: i32) -> (i32, i32) {
    %c0_i32 = arith.constant 0 : i32
    %c0_i32_0 = arith.constant 0 : i32
    return %c0_i32, %arg1 : i32, i32
  }
  func.func @transform_3(%arg0: i32, %arg1: i32, %arg2: i32, %arg3: i32) -> (i32, i32) {
    %c0_i32 = arith.constant 0 : i32
    %c0_i32_0 = arith.constant 0 : i32
    return %c0_i32, %arg1 : i32, i32
  }
  func.func @transform_4(%arg0: i32, %arg1: i32, %arg2: i32, %arg3: i32) -> (i32, i32, i32, i32) {
    %c0_i32 = arith.constant 0 : i32
    return %arg0, %arg2, %arg3, %arg1 : i32, i32, i32, i32
  }
}

</mosaic_0001>

<bundles_post_ra>
// kernel: joint_network_pallas.1
= control target key start
LH: loop header
LB: loop body
LE: loop exit
PB: predicated region body
PF: predicated region fallthrough
CT: control target
= control target key end

     0   :  { %s1018_s15 = smov 0   ;;  %s1020_s16 = smov 0   ;;  %s1104_s0 = inlined_call_operand.vmem [shape: f32[2,8,128], index: 0, kind: input, shape index: {}]   ;;  %s1105_s1 = inlined_call_operand.vmem [shape: f32[2,16,128], index: 1, kind: input, shape index: {}]   ;;  %s1106_s2 = inlined_call_operand.vmem [shape: bf16[128,128], index: 2, kind: input, shape index: {}]   ;;  %s1107_s3 = inlined_call_operand.vmem [shape: f32[1,128], index: 3, kind: input, shape index: {}]   ;;  %s1108_s4 = inlined_call_operand.vmem [shape: f32[2,8,16,128], index: 4, kind: output, shape index: {}]  }
   0x1   :  { %s1022_s17 = smov 0  }
   0x2 LB: > { %s40_s18 = sadd.s32 1, %s986_s16  ;;  %p819_p0 = scmp.ge.s32.totalorder %s990_s17, 1  ;;  %s990_s17 = sphi %s1022_s17, %s14_s17   ;;  %s986_s16 = sphi %s1020_s16, %s1110_s16   ;;  %s982_s15 = sphi %s1018_s15, %s1109_s15  }
   0x3   : > { %p42_p1 = scmp.ge.s32.totalorder %s40_s18, 2  ;;  %p232_p2 = scmp.lt.s32.totalorder %s990_s17, 3 }
   0x5   : > { %s1112_s18 = smov (%p42_p1, %s40_s18), 0  ;;  %p233_p3 = pnand %p819_p0, %p232_p2 }
   0x6   : > { %p288_p4 = scmp.lt.s32.totalorder (!%p233_p3), %s982_s15, 1 }
   0x7   : > { %236 = sbr.rel (%p233_p3) target bundleno = 260 (0x104), region = 36 }
   0xc   : > { %v927_v0 = vld [vmem:[%s1106_s2 + $0x38] sm:$0xff]   ;;  %v928_v1 = vld [vmem:[%s1106_s2 + $0x30] sm:$0xff]   ;;  %s1114_s15 = smov (!%p288_p4, %s982_s15), 1  ;;  %v929_v2 = vld [vmem:[%s1106_s2 + $0x28] sm:$0xff]   ;;  %v340_v3 = vlaneseq  ;;  %v992_v6 = vmov 1966171168  }
   0xd   : > { %854 = vmatprep.subr.bf16.mxu0 %v927_v0  ;;  %886 = vmatprep.subr.bf16.mxu1 %v927_v0  ;;  %s820_s25 = sshll.u32 %s1114_s15, 3  ;;  %v930_v4 = vld [vmem:[%s1106_s2 + $0x20] sm:$0xff]   ;;  %v338_v7 = vunpack.c.l.s4 %v992_v6  ;;  %v931_v11 = vld [vmem:[%s1106_s2 + $0x18] sm:$0xff]   ;;  %s836_s7 = sshll.u32 %s1114_s15, 4  ;;  %v932_v16 = vld [vmem:[%s1106_s2 + $0x10] sm:$0xff]  }
   0xe   : > { %855 = vmatpush3.bf16.msra.mxu0 %v927_v0  ;;  %894 = vmatpush3.bf16.msra.mxu1 %v927_v0  ;;  %s294_s28 = scalar_lea.vmem %s1104_s0, %s820_s25  ;;  %v341_v8 = vshrl.u32 %v340_v3, 7  ;;  %s303_s10 = scalar_lea.vmem %s1105_s1, %s836_s7  ;;  %v933_v25 = vld [vmem:[%s1106_s2 + $0x8] sm:$0xff]   ;;  %v934_v37 = vld [vmem:[%s1106_s2] sm:$0xff]  }
   0xf   : > { %856 = vmatprep.subr.bf16.mxu0 %v928_v1  ;;  %887 = vmatprep.subr.bf16.mxu1 %v928_v1  ;;  %v332_v5 = vld [vmem:[%s294_s28] sm:$0xff]  ;;  %v339_v9 = vunpack.c.0.s8 %v338_v7  ;;  %v334_v22 = vld [vmem:[%s303_s10 + $0x8] sm:$0xff]  ;;  %s837_s21 = sshll.u32 %s1114_s15, 7 }
  0x10   : > { %v336_v10 = vcombine.high %v332_v5, %v332_v5  ;;  %v387_v14 = vsub.s32 0, %v341_v8  ;;  %v333_v21 = vld [vmem:[%s303_s10] sm:$0xff]  ;;  %s1077_s26 = scalar_lea.vmem %s1108_s4, %s837_s21 }
  0x11   : > { %v342_v12 = vsub.s32 %v339_v9, %v341_v8 }
  0x12   : > { %857 = vmatpush3.bf16.msra.mxu0 %v928_v1  ;;  %895 = vmatpush3.bf16.msra.mxu1 %v928_v1 }
  0x13   : > { %858 = vmatprep.subr.bf16.mxu0 %v929_v2  ;;  %888 = vmatprep.subr.bf16.mxu1 %v929_v2  ;;  %v343_v13 = vrot.slane %v332_v5, %v342_v12  ;;  %v350_v15 = vrot.slane %v336_v10, %v342_v12 }
  0x15   : > { %v351_v17 = vcombine.high %v343_v13, %v343_v13  ;;  %v359_v18 = vrot.slane %v343_v13, %v342_v12  ;;  %v352_v19 = vcombine.high %v350_v15, %v350_v15  ;;  %v366_v20 = vrot.slane %v350_v15, %v342_v12  ;;  %v825_v15 = vld [vmem:[%s1107_s3] ss:$0 sm:$0xff] }
  0x16   : > { %859 = vmatpush3.bf16.msra.mxu0 %v929_v2  ;;  %896 = vmatpush3.bf16.msra.mxu1 %v929_v2 }
  0x17   : > { %860 = vmatprep.subr.bf16.mxu0 %v930_v4  ;;  %889 = vmatprep.subr.bf16.mxu1 %v930_v4  ;;  %v381_v23 = vcombine.high %v359_v18, %v359_v18  ;;  %v388_v24 = vrot.slane %v359_v18, %v387_v14  ;;  %v404_v26 = vrot.slane %v366_v20, %v387_v14 }
  0x18   : > { %v373_v27 = vrot.slane %v351_v17, %v342_v12  ;;  %v380_v28 = vrot.slane %v352_v19, %v342_v12  ;;  %v382_v31 = vcombine.high %v366_v20, %v366_v20 }
  0x19   : > { %v425_v29 = vadd.f32 %v388_v24, %v333_v21  ;;  %v426_v30 = vadd.f32 %v388_v24, %v334_v22  ;;  %v433_v32 = vadd.f32 %v404_v26, %v333_v21  ;;  %v434_v33 = vadd.f32 %v404_v26, %v334_v22 }
  0x1a   : > { %861 = vmatpush3.bf16.msra.mxu0 %v930_v4  ;;  %897 = vmatpush3.bf16.msra.mxu1 %v930_v4  ;;  %v392_v34 = vrot.slane %v373_v27, %v387_v14  ;;  %v408_v35 = vrot.slane %v380_v28, %v387_v14  ;;  %v396_v36 = vrot.slane %v381_v23, %v387_v14 }
  0x1b   : > { %862 = vmatprep.subr.bf16.mxu0 %v931_v11  ;;  %890 = vmatprep.subr.bf16.mxu1 %v931_v11  ;;  %936 = vtanh.f32 %v425_v29  ;;  %v412_v41 = vrot.slane %v382_v31, %v387_v14  ;;  %v383_v42 = vcombine.high %v373_v27, %v373_v27  ;;  %v384_v44 = vcombine.high %v380_v28, %v380_v28 }
  0x1c   : > { %938 = vtanh.f32 %v426_v30  ;;  %v427_v38 = vadd.f32 %v392_v34, %v333_v21  ;;  %v428_v39 = vadd.f32 %v392_v34, %v334_v22  ;;  %v435_v40 = vadd.f32 %v408_v35, %v333_v21 }
  0x1d   : > { %940 = vtanh.f32 %v433_v32  ;;  %v436_v43 = vadd.f32 %v408_v35, %v334_v22  ;;  %v429_v45 = vadd.f32 %v396_v36, %v333_v21  ;;  %v400_v46 = vrot.slane %v383_v42, %v387_v14 }
  0x1e   : > { %863 = vmatpush3.bf16.msra.mxu0 %v931_v11  ;;  %898 = vmatpush3.bf16.msra.mxu1 %v931_v11  ;;  %942 = vtanh.f32 %v434_v33  ;;  %v430_v47 = vadd.f32 %v396_v36, %v334_v22  ;;  %v437_v48 = vadd.f32 %v412_v41, %v333_v21  ;;  %v416_v49 = vrot.slane %v384_v44, %v387_v14 }
  0x1f   : > { %864 = vmatprep.subr.bf16.mxu0 %v932_v16  ;;  %891 = vmatprep.subr.bf16.mxu1 %v932_v16  ;;  %944 = vtanh.f32 %v427_v38  ;;  %v438_v50 = vadd.f32 %v412_v41, %v334_v22  ;;  %v431_v51 = vadd.f32 %v400_v46, %v333_v21  ;;  %v432_v52 = vadd.f32 %v400_v46, %v334_v22 }
  0x20   : > { %946 = vtanh.f32 %v428_v39  ;;  %v439_v53 = vadd.f32 %v416_v49, %v333_v21  ;;  %v440_v54 = vadd.f32 %v416_v49, %v334_v22 }
  0x21   : > { %948 = vtanh.f32 %v435_v40 }
  0x22   : > { %865 = vmatpush3.bf16.msra.mxu0 %v932_v16  ;;  %899 = vmatpush3.bf16.msra.mxu1 %v932_v16  ;;  %950 = vtanh.f32 %v436_v43 }
  0x23   : > { %866 = vmatprep.subr.bf16.mxu0 %v933_v25  ;;  %892 = vmatprep.subr.bf16.mxu1 %v933_v25  ;;  %952 = vtanh.f32 %v429_v45 }
  0x24   : > { %954 = vtanh.f32 %v430_v47 }
  0x25   : > { %956 = vtanh.f32 %v437_v48 }
  0x26   : > { %867 = vmatpush3.bf16.msra.mxu0 %v933_v25  ;;  %900 = vmatpush3.bf16.msra.mxu1 %v933_v25  ;;  %958 = vtanh.f32 %v438_v50 }
  0x27   : > { %868 = vmatprep.subr.bf16.mxu0 %v934_v37  ;;  %893 = vmatprep.subr.bf16.mxu1 %v934_v37  ;;  %960 = vtanh.f32 %v431_v51 }
  0x28   : > { %v937_v55 = vpop.eup %936  ;;  %962 = vtanh.f32 %v432_v52 }
  0x29   : > { %v939_v56 = vpop.eup %938  ;;  %964 = vtanh.f32 %v439_v53 }
  0x2a   : > { %869 = vmatpush3.bf16.msra.mxu0 %v934_v37  ;;  %901 = vmatpush3.bf16.msra.mxu1 %v934_v37  ;;  %v941_v57 = vpop.eup %940  ;;  %v457_v58 = vpack.c.bf16 %v939_v56, %v937_v55  ;;  %966 = vtanh.f32 %v440_v54 }
  0x2b   : > { %v943_v59 = vpop.eup %942 }
  0x2c   : > { %v945_v60 = vpop.eup %944  ;;  %870 = vmatprep.mubr.bf16.mxu0 %v457_v58  ;;  %v461_v61 = vpack.c.bf16 %v943_v59, %v941_v57 }
  0x2d   : > { %v947_v62 = vpop.eup %946 }
  0x2e   : > { %v949_v63 = vpop.eup %948  ;;  %878 = vmatprep.mubr.bf16.mxu1 %v461_v61  ;;  %v458_v0 = vpack.c.bf16 %v947_v62, %v945_v60 }
  0x2f   : > { %v951_v1 = vpop.eup %950 }
  0x30   : > { %v953_v2 = vpop.eup %952  ;;  %871 = vmatmul.mubr.bf16.vlgmr.msra.gmra.mxu0 %v458_v0  ;;  %v462_v3 = vpack.c.bf16 %v951_v1, %v949_v63 }
  0x31   : > { %v955_v4 = vpop.eup %954 }
  0x32   : > { %v957_v5 = vpop.eup %956  ;;  %879 = vmatmul.mubr.bf16.vlgmr.msra.gmra.mxu1 %v462_v3  ;;  %v459_v6 = vpack.c.bf16 %v955_v4, %v953_v2 }
  0x33   : > { %v959_v7 = vpop.eup %958 }
  0x34   : > { %v961_v8 = vpop.eup %960  ;;  %874 = vmatprep.mubr.bf16.mxu0 %v459_v6  ;;  %v463_v9 = vpack.c.bf16 %v959_v7, %v957_v5 }
  0x35   : > { %v963_v10 = vpop.eup %962 }
  0x36   : > { %v965_v11 = vpop.eup %964  ;;  %882 = vmatprep.mubr.bf16.mxu1 %v463_v9  ;;  %v460_v12 = vpack.c.bf16 %v963_v10, %v961_v8 }
  0x37   : > { %v967_v13 = vpop.eup %966 }
  0x38   : > { %875 = vmatmul.mubr.bf16.gmra.mxu0 %v460_v12  ;;  %v464_v14 = vpack.c.bf16 %v967_v13, %v965_v11 }
  0x3a   : > { %883 = vmatmul.mubr.bf16.gmra.mxu1 %v464_v14 }
  0xf0   : > { %v872_v16 = vpop.f32.mrf.mxu0 }
  0xf1   : > { %v579_v17 = vadd.f32 %v872_v16, %v825_v15 }
  0xf2   : > { %v880_v18 = vpop.f32.mrf.mxu1  ;;  %v570_v19 = vpop.f32.mrf.mxu0 }
  0xf3   : > { %635 = vst [vmem:[%s1077_s26 + $0x10] sm:$0xff] %v579_v17  ;;  %v611_v20 = vadd.f32 %v880_v18, %v825_v15  ;;  %v571_v21 = vadd.f32 %v825_v15, %v570_v19 }
  0xf4   : > { %v602_v22 = vpop.f32.mrf.mxu1  ;;  %v873_v23 = vpop.f32.mrf.mxu0 }
  0xf5   : > { %643 = vst [vmem:[%s1077_s26 + $0x50] sm:$0xff] %v611_v20  ;;  %633 = vst [vmem:[%s1077_s26] sm:$0xff] %v571_v21  ;;  %v603_v24 = vadd.f32 %v825_v15, %v602_v22  ;;  %v582_v25 = vadd.f32 %v873_v23, %v825_v15 }
  0xf6   : > { %v881_v26 = vpop.f32.mrf.mxu1  ;;  %v573_v27 = vpop.f32.mrf.mxu0 }
  0xf7   : > { %641 = vst [vmem:[%s1077_s26 + $0x40] sm:$0xff] %v603_v24  ;;  %636 = vst [vmem:[%s1077_s26 + $0x18] sm:$0xff] %v582_v25  ;;  %v614_v28 = vadd.f32 %v881_v26, %v825_v15  ;;  %v574_v29 = vadd.f32 %v825_v15, %v573_v27 }
  0xf8   : > { %v605_v30 = vpop.f32.mrf.mxu1  ;;  %v876_v31 = vpop.f32.mrf.mxu0 }
  0xf9   : > { %644 = vst [vmem:[%s1077_s26 + $0x58] sm:$0xff] %v614_v28  ;;  %634 = vst [vmem:[%s1077_s26 + $0x8] sm:$0xff] %v574_v29  ;;  %v606_v32 = vadd.f32 %v825_v15, %v605_v30  ;;  %v595_v33 = vadd.f32 %v876_v31, %v825_v15 }
  0xfa   : > { %v884_v34 = vpop.f32.mrf.mxu1  ;;  %v586_v35 = vpop.f32.mrf.mxu0 }
  0xfb   : > { %642 = vst [vmem:[%s1077_s26 + $0x48] sm:$0xff] %v606_v32  ;;  %639 = vst [vmem:[%s1077_s26 + $0x30] sm:$0xff] %v595_v33  ;;  %v627_v36 = vadd.f32 %v884_v34, %v825_v15  ;;  %v587_v37 = vadd.f32 %v825_v15, %v586_v35 }
  0xfc   : > { %v618_v38 = vpop.f32.mrf.mxu1  ;;  %v877_v39 = vpop.f32.mrf.mxu0 }
  0xfd   : > { %647 = vst [vmem:[%s1077_s26 + $0x70] sm:$0xff] %v627_v36  ;;  %637 = vst [vmem:[%s1077_s26 + $0x20] sm:$0xff] %v587_v37  ;;  %v619_v40 = vadd.f32 %v825_v15, %v618_v38  ;;  %v598_v41 = vadd.f32 %v877_v39, %v825_v15 }
  0xfe   : > { %v885_v42 = vpop.f32.mrf.mxu1  ;;  %v589_v43 = vpop.f32.mrf.mxu0 }
  0xff   : > { %645 = vst [vmem:[%s1077_s26 + $0x60] sm:$0xff] %v619_v40  ;;  %640 = vst [vmem:[%s1077_s26 + $0x38] sm:$0xff] %v598_v41  ;;  %v630_v44 = vadd.f32 %v885_v42, %v825_v15  ;;  %v590_v45 = vadd.f32 %v825_v15, %v589_v43 }
 0x100   : > { %v621_v46 = vpop.f32.mrf.mxu1 }
 0x101   : > { %648 = vst [vmem:[%s1077_s26 + $0x78] sm:$0xff] %v630_v44  ;;  %638 = vst [vmem:[%s1077_s26 + $0x28] sm:$0xff] %v590_v45  ;;  %v622_v47 = vadd.f32 %v825_v15, %v621_v46 }
 0x103   : > { %646 = vst [vmem:[%s1077_s26 + $0x68] sm:$0xff] %v622_v47 }
 0x104 PF: > { %s14_s17 = sadd.s32 1, %s990_s17   ;;  %s1109_s15 = smov %s986_s16 }
 0x105   : > { %p11_p5 = scmp.ge.s32.totalorder %s14_s17, 4   ;;  %s1110_s16 = smov %s1112_s18 }
 0x107   :  { %13 = sbr.rel (!%p11_p5) target bundleno = 2 (0x2), region = 75 }

</bundles_post_ra>
